<compile_context>
chip_gen: v5e
topology: v5e:2x2
jax: 0.10.0
libtpu: 0.0.40
codegen_flags: <defaults>
</compile_context>

<pallas_src>
import functools

import jax
import jax.numpy as jnp
from jax.experimental import pallas as pl
from jax.experimental.pallas import tpu as pltpu


def _round_up(x, m):
    return (x + m - 1) // m * m


def _cdiv(a, b):
    return (a + b - 1) // b


def _complex_projection_kernel(xr_ref, xi_ref, a_ref, b_ref, bias_ref, out_ref):
    # Single fused GEMM stage:  out = xr @ A + xi @ B + bias
    acc = jnp.dot(xr_ref[...], a_ref[...], preferred_element_type=jnp.float32)
    acc = acc + jnp.dot(xi_ref[...], b_ref[...], preferred_element_type=jnp.float32)
    out_ref[...] = (acc + bias_ref[...]).astype(out_ref.dtype)


@functools.partial(jax.jit, static_argnames=("tm", "compute_dtype"))
def complex_projection(x_real, x_imag, params, *, tm=512,
                       compute_dtype=jnp.float32):
    """x_real/x_imag: (B, L, d_model) float32. Returns (B, L, freq_len).

    compute_dtype=jnp.bfloat16 is recommended on v6e/v7x (halves HBM/VMEM and
    doubles MXU rate); accumulation stays f32 either way.
    """
    wr, br, wi, bi, wo, bo = (params["wr"], params["br"], params["wi"],
                              params["bi"], params["wo"], params["bo"])
    B, L, D = x_real.shape
    F = wo.shape[1]
    M = B * L

    # ---- Collapse the two linear stages (exact, the op is linear) ----------
    wo_r = wo[:D]                      # (D, F)
    wo_i = wo[D:]                      # (D, F)
    A = wr @ wo_r + wi @ wo_i          # (D, F)
    Bm = wr @ wo_i - wi @ wo_r         # (D, F)
    b_fused = bo + (br - bi) @ wo_r + (br + bi) @ wo_i   # (F,)

    # ---- Lane/row alignment -------------------------------------------------
    D_pad = _round_up(D, 128)
    F_pad = _round_up(F, 128)
    M8 = _round_up(M, 8)

    # Row tile: multiple of 8, no larger than the row count, and small enough
    # that the grid has >= 2 steps when possible (v7x has 2 TensorCores).
    tm = max(8, (int(tm) // 8) * 8)
    tm_eff = min(tm, M8)
    if M8 > 8:
        tm_eff = min(tm_eff, _round_up(_cdiv(M8, 2), 8))
    grid_m = _cdiv(M8, tm_eff)

    # Activations: flatten leading dims; pad only when actually needed.
    xr2 = x_real.reshape(M, D)
    xi2 = x_imag.reshape(M, D)
    if M8 != M or D_pad != D:
        xr2 = jnp.pad(xr2, ((0, M8 - M), (0, D_pad - D)))
        xi2 = jnp.pad(xi2, ((0, M8 - M), (0, D_pad - D)))

    # Weights / bias padding (bias stays f32 — added to the f32 accumulator).
    if D_pad != D or F_pad != F:
        A = jnp.pad(A, ((0, D_pad - D), (0, F_pad - F)))
        Bm = jnp.pad(Bm, ((0, D_pad - D), (0, F_pad - F)))
    bias_p = jnp.pad(b_fused.astype(jnp.float32), (0, F_pad - F)).reshape(1, F_pad)

    # Optional bf16 compute for activations / weights.
    xr2 = xr2.astype(compute_dtype)
    xi2 = xi2.astype(compute_dtype)
    A = A.astype(compute_dtype)
    Bm = Bm.astype(compute_dtype)

    # ---- VMEM budget & cost estimate ---------------------------------------
    cbytes = jnp.dtype(compute_dtype).itemsize
    vmem_bytes = (
        2 * 2 * tm_eff * D_pad * cbytes      # xr, xi streamed, double-buffered
        + 2 * D_pad * F_pad * cbytes         # A, B resident, single-buffered
        + F_pad * 4                          # fused bias (f32)
        + 2 * tm_eff * F_pad * 4             # output tile, double-buffered (f32)
    )
    vmem_limit = int(min(max(int(vmem_bytes * 1.3) + (1 << 20), 4 << 20), 100 << 20))

    cost = pl.CostEstimate(
        flops=2 * 2 * M8 * D_pad * F_pad,
        transcendentals=0,
        bytes_accessed=(2 * M8 * D_pad + 2 * D_pad * F_pad + F_pad) * cbytes
                       + M8 * F_pad * 4,
    )

    # Grid-invariant operands: a single VMEM buffer is enough.
    resident = pl.Buffered(1)

    out = pl.pallas_call(
        _complex_projection_kernel,
        out_shape=jax.ShapeDtypeStruct((M8, F_pad), jnp.float32),
        grid_spec=pltpu.PrefetchScalarGridSpec(
            num_scalar_prefetch=0,
            grid=(grid_m,),
            in_specs=[
                pl.BlockSpec((tm_eff, D_pad), lambda i: (i, 0)),   # x_real tile
                pl.BlockSpec((tm_eff, D_pad), lambda i: (i, 0)),   # x_imag tile
                pl.BlockSpec((D_pad, F_pad), lambda i: (0, 0),
                             pipeline_mode=resident),              # A (resident)
                pl.BlockSpec((D_pad, F_pad), lambda i: (0, 0),
                             pipeline_mode=resident),              # B (resident)
                pl.BlockSpec((1, F_pad), lambda i: (0, 0),
                             pipeline_mode=resident),              # fused bias
            ],
            out_specs=pl.BlockSpec((tm_eff, F_pad), lambda i: (i, 0)),
        ),
        compiler_params=pltpu.CompilerParams(
            dimension_semantics=("parallel",),
            vmem_limit_bytes=vmem_limit),
        cost_estimate=cost,
    )(xr2, xi2, A, Bm, bias_p)

    return out[:M, :F].reshape(B, L, F)


def init_params(key, d_model, freq_len):
    """Deterministic synthetic params matching nn.Linear shapes.

    nn.Linear(in, out) stores weight (out, in); we store the transpose (in, out)
    so the math is x @ W + b directly.
    """
    k = jax.random.split(key, 6)
    s_d = 1.0 / jnp.sqrt(d_model)
    s_c = 1.0 / jnp.sqrt(2 * d_model)
    return dict(
        wr=jax.random.uniform(k[0], (d_model, d_model), jnp.float32, -s_d, s_d),
        br=jax.random.uniform(k[1], (d_model,), jnp.float32, -s_d, s_d),
        wi=jax.random.uniform(k[2], (d_model, d_model), jnp.float32, -s_d, s_d),
        bi=jax.random.uniform(k[3], (d_model,), jnp.float32, -s_d, s_d),
        wo=jax.random.uniform(k[4], (2 * d_model, freq_len), jnp.float32, -s_c, s_c),
        bo=jax.random.uniform(k[5], (freq_len,), jnp.float32, -s_c, s_c),
    )


def reference(x_real, x_imag, p):
    """Literal two-stage reference matching the PyTorch module."""
    real_part = (x_real @ p["wr"] + p["br"]) - (x_imag @ p["wi"] + p["bi"])
    imag_part = (x_real @ p["wi"] + p["bi"]) + (x_imag @ p["wr"] + p["br"])
    cat = jnp.concatenate([real_part, imag_part], axis=-1)
    return cat @ p["wo"] + p["bo"]


if __name__ == "__main__":
    B, L, d_model, freq_len = 2, 8, 32, 16

    key = jax.random.PRNGKey(0)
    kx, kp = jax.random.split(key)
    kxr, kxi = jax.random.split(kx)

    x_real = jax.random.normal(kxr, (B, L, d_model), jnp.float32)
    x_imag = jax.random.normal(kxi, (B, L, d_model), jnp.float32)
    params = init_params(kp, d_model, freq_len)

    out = complex_projection(x_real, x_imag, params)
    out = jax.block_until_ready(out)

    ref = reference(x_real, x_imag, params)
    assert out.shape == (B, L, freq_len)
    assert jnp.allclose(out, ref, atol=1e-4, rtol=1e-4), \
        float(jnp.max(jnp.abs(out - ref)))

    print("KERNEL_OK")
</pallas_src>

<mosaic_0001>
module attributes {stable_mosaic.version = 11 : i64} {
  func.func @_complex_projection_kernel(%arg0: i32, %arg1: memref<8x128xf32, #tpu.memory_space<vmem>>, %arg2: memref<8x128xf32, #tpu.memory_space<vmem>>, %arg3: memref<128x128xf32, #tpu.memory_space<vmem>>, %arg4: memref<128x128xf32, #tpu.memory_space<vmem>>, %arg5: memref<1x128xf32, #tpu.memory_space<vmem>>, %arg6: memref<8x128xf32, #tpu.memory_space<vmem>>) attributes {dimension_semantics = [#tpu.dimension_semantics<parallel>], iteration_bounds = array<i64: 2>, scalar_prefetch = 0 : i64, scratch_operands = 0 : i64, tpu.core_type = #tpu.core_type<tc>, window_params = [{transform_indices = @transform_0, window_bounds = array<i64: 8, 128>}, {transform_indices = @transform_1, window_bounds = array<i64: 8, 128>}, {pipeline_mode = #tpu.pipeline_mode<synchronous>, transform_indices = @transform_2, window_bounds = array<i64: 128, 128>}, {pipeline_mode = #tpu.pipeline_mode<synchronous>, transform_indices = @transform_3, window_bounds = array<i64: 128, 128>}, {pipeline_mode = #tpu.pipeline_mode<synchronous>, transform_indices = @transform_4, window_bounds = array<i64: 1, 128>}, {transform_indices = @transform_5, window_bounds = array<i64: 8, 128>}]} {
    %c0 = arith.constant 0 : index
    %c0_0 = arith.constant 0 : index
    %0 = vector.load %arg1[%c0, %c0_0] : memref<8x128xf32, #tpu.memory_space<vmem>>, vector<8x128xf32>
    %c0_1 = arith.constant 0 : index
    %c0_2 = arith.constant 0 : index
    %1 = vector.load %arg3[%c0_1, %c0_2] : memref<128x128xf32, #tpu.memory_space<vmem>>, vector<128x128xf32>
    %cst = arith.constant dense<0.000000e+00> : vector<8x128xf32>
    %2 = tpu.matmul %0, %1, %cst {dimension_numbers = #tpu.dot_dimension_numbers<[1], [0], [0], [1], [0, 0, 1, 1], [], []>} : vector<8x128xf32>, vector<128x128xf32>, vector<8x128xf32> -> vector<8x128xf32>
    %c0_3 = arith.constant 0 : index
    %c0_4 = arith.constant 0 : index
    %3 = vector.load %arg2[%c0_3, %c0_4] : memref<8x128xf32, #tpu.memory_space<vmem>>, vector<8x128xf32>
    %c0_5 = arith.constant 0 : index
    %c0_6 = arith.constant 0 : index
    %4 = vector.load %arg4[%c0_5, %c0_6] : memref<128x128xf32, #tpu.memory_space<vmem>>, vector<128x128xf32>
    %cst_7 = arith.constant dense<0.000000e+00> : vector<8x128xf32>
    %5 = tpu.matmul %3, %4, %cst_7 {dimension_numbers = #tpu.dot_dimension_numbers<[1], [0], [0], [1], [0, 0, 1, 1], [], []>} : vector<8x128xf32>, vector<128x128xf32>, vector<8x128xf32> -> vector<8x128xf32>
    %6 = arith.addf %2, %5 : vector<8x128xf32>
    %c0_8 = arith.constant 0 : index
    %c0_9 = arith.constant 0 : index
    %7 = vector.load %arg5[%c0_8, %c0_9] : memref<1x128xf32, #tpu.memory_space<vmem>>, vector<1x128xf32>
    %8 = vector.broadcast %7 : vector<1x128xf32> to vector<8x128xf32>
    %9 = arith.addf %6, %8 : vector<8x128xf32>
    %c0_10 = arith.constant 0 : index
    %c0_11 = arith.constant 0 : index
    %10 = vector.load %arg6[%c0_10, %c0_11] : memref<8x128xf32, #tpu.memory_space<vmem>>, vector<8x128xf32>
    tpu.vector_store %arg6[%c0_10, %c0_11], %9 {strides = array<i32>} : memref<8x128xf32, #tpu.memory_space<vmem>>, vector<8x128xf32>,
    return
  }
  func.func @transform_0(%arg0: i32) -> (i32, i32) {
    %c0_i32 = arith.constant 0 : i32
    %c0_i32_0 = arith.constant 0 : i32
    return %arg0, %c0_i32 : i32, i32
  }
  func.func @transform_1(%arg0: i32) -> (i32, i32) {
    %c0_i32 = arith.constant 0 : i32
    %c0_i32_0 = arith.constant 0 : i32
    return %arg0, %c0_i32 : i32, i32
  }
  func.func @transform_2(%arg0: i32) -> (i32, i32) {
    %c0_i32 = arith.constant 0 : i32
    %c0_i32_0 = arith.constant 0 : i32
    %c0_i32_1 = arith.constant 0 : i32
    return %c0_i32, %c0_i32_0 : i32, i32
  }
  func.func @transform_3(%arg0: i32) -> (i32, i32) {
    %c0_i32 = arith.constant 0 : i32
    %c0_i32_0 = arith.constant 0 : i32
    %c0_i32_1 = arith.constant 0 : i32
    return %c0_i32, %c0_i32_0 : i32, i32
  }
  func.func @transform_4(%arg0: i32) -> (i32, i32) {
    %c0_i32 = arith.constant 0 : i32
    %c0_i32_0 = arith.constant 0 : i32
    %c0_i32_1 = arith.constant 0 : i32
    return %c0_i32, %c0_i32_0 : i32, i32
  }
  func.func @transform_5(%arg0: i32) -> (i32, i32) {
    %c0_i32 = arith.constant 0 : i32
    %c0_i32_0 = arith.constant 0 : i32
    return %arg0, %c0_i32 : i32, i32
  }
}

</mosaic_0001>

<bundles_post_ra>
// kernel: complex_projection.1
= control target key start
LH: loop header
LB: loop body
LE: loop exit
PB: predicated region body
PF: predicated region fallthrough
CT: control target
= control target key end

     0   :  { %s439_s18 = smov 0   ;;  %s562_s0 = inlined_call_operand.vmem [shape: f32[16,128], index: 0, kind: input, shape index: {}]   ;;  %s563_s1 = inlined_call_operand.vmem [shape: f32[16,128], index: 1, kind: input, shape index: {}]   ;;  %s564_s2 = inlined_call_operand.vmem [shape: f32[128,128], index: 2, kind: input, shape index: {}]   ;;  %s565_s3 = inlined_call_operand.vmem [shape: f32[128,128], index: 3, kind: input, shape index: {}]   ;;  %s566_s4 = inlined_call_operand.vmem [shape: f32[1,128], index: 4, kind: input, shape index: {}]   ;;  %s567_s5 = inlined_call_operand.vmem [shape: f32[16,128], index: 5, kind: output, shape index: {}]  }
   0x1 LB: > { %s382_s19 = sadd.s32 4294967295, %s407_s18   ;;  %p386_p0 = scmp.ge.s32.totalorder %s407_s18, 1  ;;  %s407_s18 = sphi %s439_s18, %s15_s18  }
   0x2   : > { %p195_p1 = scmp.lt.s32.totalorder %s407_s18, 3 }
   0x4   : > { %p196_p2 = pnand %p386_p0, %p195_p1 }
   0x5   : > { %p225_p3 = scmp.lt.s32.totalorder (!%p196_p2), %s382_s19, 1 }
   0x6   : > { %199 = sbr.rel (%p196_p2) target bundleno = 175 (0xaf), region = 40 }
   0xb   : > { %v270_v0 = vld [vmem:[%s565_s3 + $0x78] sm:$0xff]  ;;  %v269_v2 = vld [vmem:[%s565_s3 + $0x70] sm:$0xff]  ;;  %v268_v4 = vld [vmem:[%s565_s3 + $0x68] sm:$0xff]  ;;  %s569_s19 = smov (!%p225_p3, %s382_s19), 1 }
   0xc   : > { %v253_v1 = vld [vmem:[%s564_s2 + $0x78] sm:$0xff]  ;;  %271 = vmatpush.msra.mxu0 %v270_v0  ;;  %v252_v3 = vld [vmem:[%s564_s2 + $0x70] sm:$0xff]  ;;  %v251_v5 = vld [vmem:[%s564_s2 + $0x68] sm:$0xff]  ;;  %s387_s26 = sshll.u32 %s569_s19, 3 }
   0xd   : > { %291 = vmatpush.msra.mxu1 %v253_v1  ;;  %v267_v6 = vld [vmem:[%s565_s3 + $0x60] sm:$0xff]  ;;  %v266_v8 = vld [vmem:[%s565_s3 + $0x58] sm:$0xff]  ;;  %v265_v10 = vld [vmem:[%s565_s3 + $0x50] sm:$0xff]  ;;  %s232_s11 = scalar_lea.vmem %s563_s1, %s387_s26  ;;  %s228_s14 = scalar_lea.vmem %s562_s0, %s387_s26 }
   0xe   : > { %272 = vmatpush.msra.mxu0 %v269_v2  ;;  %v250_v7 = vld [vmem:[%s564_s2 + $0x60] sm:$0xff]  ;;  %v249_v9 = vld [vmem:[%s564_s2 + $0x58] sm:$0xff]  ;;  %v248_v11 = vld [vmem:[%s564_s2 + $0x50] sm:$0xff]  ;;  %s236_s25 = scalar_lea.vmem %s567_s5, %s387_s26 }
   0xf   : > { %292 = vmatpush.msra.mxu1 %v252_v3  ;;  %v264_v12 = vld [vmem:[%s565_s3 + $0x48] sm:$0xff]  ;;  %v263_v14 = vld [vmem:[%s565_s3 + $0x40] sm:$0xff]  ;;  %v262_v16 = vld [vmem:[%s565_s3 + $0x38] sm:$0xff] }
  0x10   : > { %273 = vmatpush.msra.mxu0 %v268_v4  ;;  %v247_v13 = vld [vmem:[%s564_s2 + $0x48] sm:$0xff]  ;;  %v246_v15 = vld [vmem:[%s564_s2 + $0x40] sm:$0xff]  ;;  %v245_v17 = vld [vmem:[%s564_s2 + $0x38] sm:$0xff] }
  0x11   : > { %293 = vmatpush.msra.mxu1 %v251_v5  ;;  %v261_v18 = vld [vmem:[%s565_s3 + $0x30] sm:$0xff]  ;;  %v260_v20 = vld [vmem:[%s565_s3 + $0x28] sm:$0xff]  ;;  %v259_v22 = vld [vmem:[%s565_s3 + $0x20] sm:$0xff] }
  0x12   : > { %274 = vmatpush.msra.mxu0 %v267_v6  ;;  %v244_v19 = vld [vmem:[%s564_s2 + $0x30] sm:$0xff]  ;;  %v243_v21 = vld [vmem:[%s564_s2 + $0x28] sm:$0xff]  ;;  %v242_v23 = vld [vmem:[%s564_s2 + $0x20] sm:$0xff] }
  0x13   : > { %294 = vmatpush.msra.mxu1 %v250_v7  ;;  %v258_v24 = vld [vmem:[%s565_s3 + $0x18] sm:$0xff]  ;;  %v257_v26 = vld [vmem:[%s565_s3 + $0x10] sm:$0xff]  ;;  %v256_v28 = vld [vmem:[%s565_s3 + $0x8] sm:$0xff] }
  0x14   : > { %275 = vmatpush.msra.mxu0 %v266_v8  ;;  %v241_v25 = vld [vmem:[%s564_s2 + $0x18] sm:$0xff]  ;;  %v240_v27 = vld [vmem:[%s564_s2 + $0x10] sm:$0xff]  ;;  %v239_v29 = vld [vmem:[%s564_s2 + $0x8] sm:$0xff] }
  0x15   : > { %295 = vmatpush.msra.mxu1 %v249_v9  ;;  %v255_v30 = vld [vmem:[%s565_s3] sm:$0xff] }
  0x16   : > { %276 = vmatpush.msra.mxu0 %v265_v10  ;;  %v238_v31 = vld [vmem:[%s564_s2] sm:$0xff] }
  0x17   : > { %296 = vmatpush.msra.mxu1 %v248_v11  ;;  %v254_v32 = vld [vmem:[%s232_s11] sm:$0xff] }
  0x18   : > { %277 = vmatpush.msra.mxu0 %v264_v12  ;;  %v237_v33 = vld [vmem:[%s228_s14] sm:$0xff] }
  0x19   : > { %297 = vmatpush.msra.mxu1 %v247_v13  ;;  %v400_v34 = vld [vmem:[%s566_s4] ss:$0 sm:$0xff] }
  0x1a   : > { %278 = vmatpush.msra.mxu0 %v263_v14 }
  0x1b   : > { %298 = vmatpush.msra.mxu1 %v246_v15 }
  0x1c   : > { %279 = vmatpush.msra.mxu0 %v262_v16 }
  0x1d   : > { %299 = vmatpush.msra.mxu1 %v245_v17 }
  0x1e   : > { %280 = vmatpush.msra.mxu0 %v261_v18 }
  0x1f   : > { %300 = vmatpush.msra.mxu1 %v244_v19 }
  0x20   : > { %281 = vmatpush.msra.mxu0 %v260_v20 }
  0x21   : > { %301 = vmatpush.msra.mxu1 %v243_v21 }
  0x22   : > { %282 = vmatpush.msra.mxu0 %v259_v22 }
  0x23   : > { %302 = vmatpush.msra.mxu1 %v242_v23 }
  0x24   : > { %283 = vmatpush.msra.mxu0 %v258_v24 }
  0x25   : > { %303 = vmatpush.msra.mxu1 %v241_v25 }
  0x26   : > { %284 = vmatpush.msra.mxu0 %v257_v26 }
  0x27   : > { %304 = vmatpush.msra.mxu1 %v240_v27 }
  0x28   : > { %285 = vmatpush.msra.mxu0 %v256_v28 }
  0x29   : > { %305 = vmatpush.msra.mxu1 %v239_v29 }
  0x2a   : > { %286 = vmatpush.msra.mxu0 %v255_v30 }
  0x2b   : > { %306 = vmatpush.msra.mxu1 %v238_v31  ;;  %287 = vmatmul.f32.vlgmr.msra.gmra.mxu0 %v254_v32 }
  0x2c   : > { %307 = vmatmul.f32.vlgmr.msra.gmra.mxu1 %v237_v33 }
  0xa8   : > { %v288_v35 = vpop.f32.mrf.mxu0 }
  0xa9   : > { %v308_v36 = vpop.f32.mrf.mxu1 }
  0xaa   : > { %v309_v37 = vadd.f32 %v308_v36, %v288_v35 }
  0xac   : > { %v315_v38 = vadd.f32 %v400_v34, %v309_v37 }
  0xae   : > { %316 = vst [vmem:[%s236_s25] sm:$0xff] %v315_v38 }
  0xaf PF: > { %s15_s18 = sadd.s32 1, %s407_s18  }
  0xb0   : > { %p12_p4 = scmp.ge.s32.totalorder %s15_s18, 4  }
  0xb2   :  { %14 = sbr.rel (!%p12_p4) target bundleno = 1 (0x1), region = 73 }

</bundles_post_ra>
